<compile_context>
chip_gen: v5e
topology: v5e:2x2
jax: 0.10.0
libtpu: 0.0.40
codegen_flags: <defaults>
</compile_context>

<pallas_src>
import functools

import jax
import jax.numpy as jnp
import numpy as np
from jax import lax
from jax.experimental import pallas as pl
from jax.experimental.pallas import tpu as pltpu


def _round_up(x, m):
    return (x + m - 1) // m * m


def _pick_block_b(B):
    """Largest batch tile (<=128, multiple of 8) dividing B that still leaves a
    grid of >= 2 steps (so the 2nd TensorCore on v7x has work); else the largest
    divisor; else the whole batch."""
    cands = (128, 64, 32, 16, 8)
    for c in cands:
        if B % c == 0 and B // c >= 2:
            return c
    for c in cands:
        if B % c == 0:
            return c
    return B


# ----------------------------- fused Pallas kernel ---------------------------


def _fused_cnn_text_kernel(x_ref, w_ref, b_ref, mask_ref, fcw_ref, fcb_ref, o_ref):
    # x_ref:    (Bb, Lp, Fp)        time-padded, lane-padded input (bf16 or f32)
    # w_ref:    (k_max, Fp, OCp)    merged per-tap conv weights (OCp lane-padded to 128)
    # b_ref:    (1, OCp)            merged conv bias (f32, zero-padded)
    # mask_ref: (L_outp, OCp)       per-conv valid-position mask (1.0 / 0.0, f32)
    # fcw_ref:  (OCp, TCp)          fc1 weight (transposed, zero-padded)
    # fcb_ref:  (1, TCp)            fc1 bias (zero-padded)
    # o_ref:    (Bb, TCp)           logits (real classes in [:, :target_class])
    Bb, Lp, Fp = x_ref.shape
    k_max, _, OCp = w_ref.shape
    L_out = Lp - k_max + 1          # padded to a multiple of 8 by the wrapper

    x = x_ref[...]
    acc = jnp.zeros((Bb * L_out, OCp), jnp.float32)
    # k_max-tap accumulating matmul: same MXU FLOPs as one im2col matmul, but no
    # 7x duplication of the input in VMEM (static Python loop -> fully unrolled).
    for dh in range(k_max):
        x_tap = x[:, dh:dh + L_out, :].reshape(Bb * L_out, Fp)
        acc = acc + jnp.dot(x_tap, w_ref[dh],
                            preferred_element_type=jnp.float32)

    acc = acc.reshape(Bb, L_out, OCp) + b_ref[...][None]   # + bias (f32)
    acc = jnp.maximum(acc, 0.0)                            # ReLU (f32, VPU)
    acc = acc * mask_ref[...][None]                        # zero pad-only positions
    pooled = jnp.max(acc, axis=1)                          # (Bb, OCp) max over time

    # fused FC (dropout = identity at inference); padded rows/cols of fcw are zero.
    o_ref[...] = jnp.dot(pooled.astype(fcw_ref.dtype), fcw_ref[...],
                         preferred_element_type=jnp.float32) + fcb_ref[...]


def fused_cnn_text(x_pad, conv_w, conv_b, mask, fc_w, fc_b):
    B, Lp, Fp = x_pad.shape
    k_max, _, OCp = conv_w.shape
    L_outp = mask.shape[0]
    TCp = fc_w.shape[1]
    assert Lp - k_max + 1 == L_outp

    block_b = _pick_block_b(B)
    grid = (B // block_b,)

    # NOTE: the constant operands (conv_w/conv_b/mask/fc_w/fc_b) have constant
    # index_maps; at large grids they could be single-buffered via
    # pipeline_mode=pl.Buffered(1) to save VMEM -- left at defaults for portability.
    return pl.pallas_call(
        _fused_cnn_text_kernel,
        out_shape=jax.ShapeDtypeStruct((B, TCp), jnp.float32),
        grid_spec=pltpu.PrefetchScalarGridSpec(
            num_scalar_prefetch=0,
            grid=grid,
            in_specs=[
                pl.BlockSpec((block_b, Lp, Fp), lambda i: (i, 0, 0)),   # x tile per batch block
                pl.BlockSpec((k_max, Fp, OCp), lambda i: (0, 0, 0)),    # merged conv weights
                pl.BlockSpec((1, OCp), lambda i: (0, 0)),               # merged conv bias
                pl.BlockSpec((L_outp, OCp), lambda i: (0, 0)),          # valid-length mask
                pl.BlockSpec((OCp, TCp), lambda i: (0, 0)),             # fc1 weight
                pl.BlockSpec((1, TCp), lambda i: (0, 0)),               # fc1 bias
            ],
            out_specs=pl.BlockSpec((block_b, TCp), lambda i: (i, 0)),
        ),
        compiler_params=pltpu.CompilerParams(
            dimension_semantics=("parallel",)),   # shard batch blocks across TCs (v7x)
    )(x_pad, conv_w, conv_b, mask, fc_w, fc_b)


# ---------------------- one-time parameter preprocessing ---------------------


def preprocess_params(params, kernel_sizes, *, mxu_dtype=jnp.bfloat16):
    """Hoist all PyTorch-layout transposes / padding / merging / dtype casts out of
    the forward path.  mxu_dtype=jnp.float32 reproduces PyTorch f32 numerics exactly;
    bf16 (default) feeds the MXU at full rate with f32 accumulation."""
    conv_names = ("conv1", "conv2", "conv3")
    k_max = max(kernel_sizes)
    w_list, b_list = [], []
    Fp = None
    for name, K in zip(conv_names, kernel_sizes):
        w = params[name + "_w"]                                    # (OC, C, K, D)  OIHW
        OC, C, K_, D = w.shape
        assert K_ == K
        F = C * D
        Fp = _round_up(F, 128)                                     # pad features to 128 lanes
        w_kfo = jnp.transpose(w, (2, 1, 3, 0)).reshape(K, F, OC)   # (K, F, OC)
        # front-pad kernel axis to K_max (valid output positions t in [0, L+K-2])
        # and zero-pad feature axis to Fp (matches lane-padded input).
        w_kfo = jnp.pad(w_kfo, ((k_max - K, 0), (0, Fp - F), (0, 0)))
        w_list.append(w_kfo)
        b_list.append(params[name + "_b"])
    w_merged = jnp.concatenate(w_list, axis=-1)                    # (k_max, Fp, 3*OC)
    OC_total = w_merged.shape[-1]
    OCp = _round_up(OC_total, 128)                                 # lane-dense channel axis
    TC = params["fc1_w"].shape[0]
    TCp = _round_up(TC, 128)                                       # lane-dense FC output

    conv_w = jnp.pad(w_merged, ((0, 0), (0, 0), (0, OCp - OC_total))).astype(mxu_dtype)
    conv_b = jnp.pad(jnp.concatenate(b_list), (0, OCp - OC_total)).reshape(1, OCp)
    fc_w = jnp.pad(params["fc1_w"].T,
                   ((0, OCp - OC_total), (0, TCp - TC))).astype(mxu_dtype)
    fc_b = jnp.pad(params["fc1_b"], (0, TCp - TC)).reshape(1, TCp)

    return {
        "non_static_embed": params["non_static_embed"],
        "static_embed": params["static_embed"],
        "conv_w": conv_w,           # (k_max, Fp, OCp)   mxu_dtype
        "conv_b": conv_b,           # (1, OCp)           f32
        "fc_w": fc_w,               # (OCp, TCp)         mxu_dtype
        "fc_b": fc_b,               # (1, TCp)           f32
    }


# ------------------------------ forward (jit) --------------------------------


@functools.partial(jax.jit,
                   static_argnames=("kernel_sizes", "output_channels", "target_class"))
def cnn_text_forward(kparams, head, headtag, x, wordtag, *, kernel_sizes,
                     output_channels, target_class):
    """Forward pass, mode='multichannel'.  x: (B, L, >=2) int32 token indices."""
    del head, headtag, wordtag  # unused in 'multichannel' mode
    words = x[:, :, 1]
    word_input = jnp.take(kparams["non_static_embed"], words, axis=0)    # (B, L, D)
    static_input = jnp.take(kparams["static_embed"], words, axis=0)      # (B, L, D)
    B, L, D = word_input.shape

    # channels folded into the feature (lane) axis: [non_static | static] -> (B, L, 2*D)
    x_flat = jnp.concatenate([word_input, static_input], axis=-1)
    F = x_flat.shape[-1]
    Fp = _round_up(F, 128)
    k_max = max(kernel_sizes)
    L_out = L + k_max - 1
    L_outp = _round_up(L_out, 8)       # sublane-aligned time axis (extra rows masked)
    pad_front = k_max - 1
    pad_back = (k_max - 1) + (L_outp - L_out)
    # single shared time pad + lane pad, then pre-cast to the MXU dtype (halves DMA).
    x_pad = jnp.pad(x_flat, ((0, 0), (pad_front, pad_back), (0, Fp - F)))
    x_pad = x_pad.astype(kparams["conv_w"].dtype)                        # (B, Lp, Fp)

    # conv with kernel K (front-padded weights): positions t >= L+K-1 see only the
    # extra zero padding (pure-bias) -> masked post-ReLU; extra alignment rows and
    # padded OC columns are masked to 0 as well, so the time max matches PyTorch's
    # per-conv padding=(K-1,0) + max_pool1d exactly.
    OCp = kparams["conv_w"].shape[-1]
    OC = output_channels
    valid_len = np.zeros((OCp,), np.int32)
    for ci, K in enumerate(kernel_sizes):
        valid_len[ci * OC:(ci + 1) * OC] = L + K - 1
    mask = (np.arange(L_outp, dtype=np.int32)[:, None]
            < valid_len[None, :]).astype(np.float32)                     # (L_outp, OCp)
    mask = jnp.asarray(mask)

    logits = fused_cnn_text(x_pad, kparams["conv_w"], kparams["conv_b"], mask,
                            kparams["fc_w"], kparams["fc_b"])            # (B, TCp)
    return logits[:, :target_class]


# ------------------------------ pure-JAX reference ---------------------------


def cnn_text_reference(params, head, headtag, x, wordtag):
    del head, headtag, wordtag
    words = x[:, :, 1]
    word_input = jnp.take(params["non_static_embed"], words, axis=0)
    static_input = jnp.take(params["static_embed"], words, axis=0)
    xs = jnp.stack([word_input, static_input], axis=1)  # (B, 2, L, D)

    pooled = []
    for name in ("conv1", "conv2", "conv3"):
        w = params[name + "_w"]
        b = params[name + "_b"]
        K = w.shape[2]
        out = lax.conv_general_dilated(
            xs, w, window_strides=(1, 1),
            padding=[(K - 1, K - 1), (0, 0)],
            dimension_numbers=("NCHW", "OIHW", "NCHW"))
        out = out + b[None, :, None, None]
        out = jnp.maximum(out, 0.0)[..., 0]              # squeeze(3), relu
        pooled.append(jnp.max(out, axis=2))              # max_pool1d over time
    feat = jnp.concatenate(pooled, axis=1)
    return feat @ params["fc1_w"].T + params["fc1_b"]


# --------------------------------- main ---------------------------------------

if __name__ == "__main__":
    # args: output_channels=8, target_class=4, words_num=100, words_dim=32,
    #       embeds_num=100, embeds_dim=32, kernel_sizes=[3,4,7], mode='multichannel'
    B, L = 2, 8
    words_num, words_dim = 100, 32
    embeds_num, embeds_dim = 100, 32
    OC, TC = 8, 4
    C_in = 2  # multichannel
    Ks = (3, 4, 7)

    key = jax.random.PRNGKey(0)
    keys = jax.random.split(key, 12)

    embeds = jax.random.normal(keys[0], (embeds_num, embeds_dim), jnp.float32) * 0.1
    params = {
        "embed": jax.random.normal(keys[1], (words_num, words_dim), jnp.float32) * 0.1,
        "static_embed": embeds,
        "non_static_embed": embeds,  # both initialized from args['embeds']
        "fc1_w": jax.random.normal(keys[2], (TC, 3 * OC), jnp.float32) * 0.1,
        "fc1_b": jax.random.normal(keys[3], (TC,), jnp.float32) * 0.1,
    }
    for i, (name, K) in enumerate(zip(("conv1", "conv2", "conv3"), Ks)):
        params[name + "_w"] = (
            jax.random.normal(keys[4 + 2 * i], (OC, C_in, K, words_dim), jnp.float32) * 0.1)
        params[name + "_b"] = (
            jax.random.normal(keys[5 + 2 * i], (OC,), jnp.float32) * 0.1)

    # inputs (forward(head, headtag, x, wordtag)); only x is used in 'multichannel'
    x = jax.random.randint(keys[10], (B, L, 2), 0, words_num, dtype=jnp.int32)
    head = jax.random.randint(keys[11], (B, L, 2), 0, words_num, dtype=jnp.int32)
    headtag = jnp.zeros((B, L, 1), jnp.float32)
    wordtag = jnp.zeros((B, L, 1), jnp.float32)

    # one-time layout/dtype prep (bf16 MXU operands, f32 accumulation in-kernel).
    kparams = preprocess_params(params, Ks, mxu_dtype=jnp.bfloat16)

    logit = cnn_text_forward(kparams, head, headtag, x, wordtag,
                             kernel_sizes=Ks, output_channels=OC, target_class=TC)
    logit = jax.block_until_ready(logit)

    ref = cnn_text_reference(params, head, headtag, x, wordtag)
    # bf16 MXU operands (f32 accumulate) vs. f32 reference -> loosened tolerance.
    np.testing.assert_allclose(np.asarray(logit), np.asarray(ref), rtol=2e-2, atol=2e-2)

    print("KERNEL_OK")
</pallas_src>

<mosaic_0001>
module attributes {stable_mosaic.version = 11 : i64} {
  func.func @_fused_cnn_text_kernel(%arg0: i32, %arg1: memref<2x22x128xbf16, #tpu.memory_space<vmem>>, %arg2: memref<7x128x128xbf16, #tpu.memory_space<vmem>>, %arg3: memref<1x128xf32, #tpu.memory_space<vmem>>, %arg4: memref<16x128xf32, #tpu.memory_space<vmem>>, %arg5: memref<128x128xbf16, #tpu.memory_space<vmem>>, %arg6: memref<1x128xf32, #tpu.memory_space<vmem>>, %arg7: memref<2x128xf32, #tpu.memory_space<vmem>>) attributes {dimension_semantics = [#tpu.dimension_semantics<parallel>], iteration_bounds = array<i64: 1>, scalar_prefetch = 0 : i64, scratch_operands = 0 : i64, tpu.core_type = #tpu.core_type<tc>, window_params = [{transform_indices = @transform_0, window_bounds = array<i64: 2, 22, 128>}, {pipeline_mode = #tpu.pipeline_mode<synchronous>, transform_indices = @transform_1, window_bounds = array<i64: 7, 128, 128>}, {pipeline_mode = #tpu.pipeline_mode<synchronous>, transform_indices = @transform_2, window_bounds = array<i64: 1, 128>}, {pipeline_mode = #tpu.pipeline_mode<synchronous>, transform_indices = @transform_3, window_bounds = array<i64: 16, 128>}, {pipeline_mode = #tpu.pipeline_mode<synchronous>, transform_indices = @transform_4, window_bounds = array<i64: 128, 128>}, {pipeline_mode = #tpu.pipeline_mode<synchronous>, transform_indices = @transform_5, window_bounds = array<i64: 1, 128>}, {transform_indices = @transform_6, window_bounds = array<i64: 2, 128>}]} {
    %c0 = arith.constant 0 : index
    %c0_0 = arith.constant 0 : index
    %c0_1 = arith.constant 0 : index
    %0 = vector.load %arg1[%c0, %c0_0, %c0_1] : memref<2x22x128xbf16, #tpu.memory_space<vmem>>, vector<2x22x128xbf16>
    %cst = arith.constant 0.000000e+00 : f32
    %1 = vector.broadcast %cst : f32 to vector<32x128xf32>
    %2 = vector.extract_strided_slice %0 {offsets = [0, 0, 0], sizes = [2, 16, 128], strides = [1, 1, 1]} : vector<2x22x128xbf16> to vector<2x16x128xbf16>
    %3 = vector.shape_cast %2 : vector<2x16x128xbf16> to vector<32x128xbf16>
    %c0_2 = arith.constant 0 : index
    %c0_3 = arith.constant 0 : index
    %c0_4 = arith.constant 0 : index
    %4 = vector.load %arg2[%c0_2, %c0_3, %c0_4] : memref<7x128x128xbf16, #tpu.memory_space<vmem>>, vector<1x128x128xbf16>
    %5 = vector.shape_cast %4 : vector<1x128x128xbf16> to vector<128x128xbf16>
    %cst_5 = arith.constant dense<0.000000e+00> : vector<32x128xf32>
    %6 = tpu.matmul %3, %5, %cst_5 {dimension_numbers = #tpu.dot_dimension_numbers<[1], [0], [0], [1], [0, 0, 1, 1], [], []>} : vector<32x128xbf16>, vector<128x128xbf16>, vector<32x128xf32> -> vector<32x128xf32>
    %7 = arith.addf %1, %6 : vector<32x128xf32>
    %8 = vector.extract_strided_slice %0 {offsets = [0, 1, 0], sizes = [2, 16, 128], strides = [1, 1, 1]} : vector<2x22x128xbf16> to vector<2x16x128xbf16>
    %9 = vector.shape_cast %8 : vector<2x16x128xbf16> to vector<32x128xbf16>
    %c1 = arith.constant 1 : index
    %c0_6 = arith.constant 0 : index
    %c0_7 = arith.constant 0 : index
    %10 = vector.load %arg2[%c1, %c0_6, %c0_7] : memref<7x128x128xbf16, #tpu.memory_space<vmem>>, vector<1x128x128xbf16>
    %11 = vector.shape_cast %10 : vector<1x128x128xbf16> to vector<128x128xbf16>
    %cst_8 = arith.constant dense<0.000000e+00> : vector<32x128xf32>
    %12 = tpu.matmul %9, %11, %cst_8 {dimension_numbers = #tpu.dot_dimension_numbers<[1], [0], [0], [1], [0, 0, 1, 1], [], []>} : vector<32x128xbf16>, vector<128x128xbf16>, vector<32x128xf32> -> vector<32x128xf32>
    %13 = arith.addf %7, %12 : vector<32x128xf32>
    %14 = vector.extract_strided_slice %0 {offsets = [0, 2, 0], sizes = [2, 16, 128], strides = [1, 1, 1]} : vector<2x22x128xbf16> to vector<2x16x128xbf16>
    %15 = vector.shape_cast %14 : vector<2x16x128xbf16> to vector<32x128xbf16>
    %c2 = arith.constant 2 : index
    %c0_9 = arith.constant 0 : index
    %c0_10 = arith.constant 0 : index
    %16 = vector.load %arg2[%c2, %c0_9, %c0_10] : memref<7x128x128xbf16, #tpu.memory_space<vmem>>, vector<1x128x128xbf16>
    %17 = vector.shape_cast %16 : vector<1x128x128xbf16> to vector<128x128xbf16>
    %cst_11 = arith.constant dense<0.000000e+00> : vector<32x128xf32>
    %18 = tpu.matmul %15, %17, %cst_11 {dimension_numbers = #tpu.dot_dimension_numbers<[1], [0], [0], [1], [0, 0, 1, 1], [], []>} : vector<32x128xbf16>, vector<128x128xbf16>, vector<32x128xf32> -> vector<32x128xf32>
    %19 = arith.addf %13, %18 : vector<32x128xf32>
    %20 = vector.extract_strided_slice %0 {offsets = [0, 3, 0], sizes = [2, 16, 128], strides = [1, 1, 1]} : vector<2x22x128xbf16> to vector<2x16x128xbf16>
    %21 = vector.shape_cast %20 : vector<2x16x128xbf16> to vector<32x128xbf16>
    %c3 = arith.constant 3 : index
    %c0_12 = arith.constant 0 : index
    %c0_13 = arith.constant 0 : index
    %22 = vector.load %arg2[%c3, %c0_12, %c0_13] : memref<7x128x128xbf16, #tpu.memory_space<vmem>>, vector<1x128x128xbf16>
    %23 = vector.shape_cast %22 : vector<1x128x128xbf16> to vector<128x128xbf16>
    %cst_14 = arith.constant dense<0.000000e+00> : vector<32x128xf32>
    %24 = tpu.matmul %21, %23, %cst_14 {dimension_numbers = #tpu.dot_dimension_numbers<[1], [0], [0], [1], [0, 0, 1, 1], [], []>} : vector<32x128xbf16>, vector<128x128xbf16>, vector<32x128xf32> -> vector<32x128xf32>
    %25 = arith.addf %19, %24 : vector<32x128xf32>
    %26 = vector.extract_strided_slice %0 {offsets = [0, 4, 0], sizes = [2, 16, 128], strides = [1, 1, 1]} : vector<2x22x128xbf16> to vector<2x16x128xbf16>
    %27 = vector.shape_cast %26 : vector<2x16x128xbf16> to vector<32x128xbf16>
    %c4 = arith.constant 4 : index
    %c0_15 = arith.constant 0 : index
    %c0_16 = arith.constant 0 : index
    %28 = vector.load %arg2[%c4, %c0_15, %c0_16] : memref<7x128x128xbf16, #tpu.memory_space<vmem>>, vector<1x128x128xbf16>
    %29 = vector.shape_cast %28 : vector<1x128x128xbf16> to vector<128x128xbf16>
    %cst_17 = arith.constant dense<0.000000e+00> : vector<32x128xf32>
    %30 = tpu.matmul %27, %29, %cst_17 {dimension_numbers = #tpu.dot_dimension_numbers<[1], [0], [0], [1], [0, 0, 1, 1], [], []>} : vector<32x128xbf16>, vector<128x128xbf16>, vector<32x128xf32> -> vector<32x128xf32>
    %31 = arith.addf %25, %30 : vector<32x128xf32>
    %32 = vector.extract_strided_slice %0 {offsets = [0, 5, 0], sizes = [2, 16, 128], strides = [1, 1, 1]} : vector<2x22x128xbf16> to vector<2x16x128xbf16>
    %33 = vector.shape_cast %32 : vector<2x16x128xbf16> to vector<32x128xbf16>
    %c5 = arith.constant 5 : index
    %c0_18 = arith.constant 0 : index
    %c0_19 = arith.constant 0 : index
    %34 = vector.load %arg2[%c5, %c0_18, %c0_19] : memref<7x128x128xbf16, #tpu.memory_space<vmem>>, vector<1x128x128xbf16>
    %35 = vector.shape_cast %34 : vector<1x128x128xbf16> to vector<128x128xbf16>
    %cst_20 = arith.constant dense<0.000000e+00> : vector<32x128xf32>
    %36 = tpu.matmul %33, %35, %cst_20 {dimension_numbers = #tpu.dot_dimension_numbers<[1], [0], [0], [1], [0, 0, 1, 1], [], []>} : vector<32x128xbf16>, vector<128x128xbf16>, vector<32x128xf32> -> vector<32x128xf32>
    %37 = arith.addf %31, %36 : vector<32x128xf32>
    %38 = vector.extract_strided_slice %0 {offsets = [0, 6, 0], sizes = [2, 16, 128], strides = [1, 1, 1]} : vector<2x22x128xbf16> to vector<2x16x128xbf16>
    %39 = vector.shape_cast %38 : vector<2x16x128xbf16> to vector<32x128xbf16>
    %c6 = arith.constant 6 : index
    %c0_21 = arith.constant 0 : index
    %c0_22 = arith.constant 0 : index
    %40 = vector.load %arg2[%c6, %c0_21, %c0_22] : memref<7x128x128xbf16, #tpu.memory_space<vmem>>, vector<1x128x128xbf16>
    %41 = vector.shape_cast %40 : vector<1x128x128xbf16> to vector<128x128xbf16>
    %cst_23 = arith.constant dense<0.000000e+00> : vector<32x128xf32>
    %42 = tpu.matmul %39, %41, %cst_23 {dimension_numbers = #tpu.dot_dimension_numbers<[1], [0], [0], [1], [0, 0, 1, 1], [], []>} : vector<32x128xbf16>, vector<128x128xbf16>, vector<32x128xf32> -> vector<32x128xf32>
    %43 = arith.addf %37, %42 : vector<32x128xf32>
    %44 = vector.shape_cast %43 : vector<32x128xf32> to vector<2x16x128xf32>
    %c0_24 = arith.constant 0 : index
    %c0_25 = arith.constant 0 : index
    %45 = vector.load %arg3[%c0_24, %c0_25] : memref<1x128xf32, #tpu.memory_space<vmem>>, vector<1x128xf32>
    %46 = vector.shape_cast %45 : vector<1x128xf32> to vector<1x1x128xf32>
    %47 = vector.broadcast %46 : vector<1x1x128xf32> to vector<2x16x128xf32>
    %48 = arith.addf %44, %47 : vector<2x16x128xf32>
    %cst_26 = arith.constant 0.000000e+00 : f32
    %49 = vector.broadcast %cst_26 : f32 to vector<2x16x128xf32>
    %50 = arith.maximumf %48, %49 : vector<2x16x128xf32>
    %c0_27 = arith.constant 0 : index
    %c0_28 = arith.constant 0 : index
    %51 = vector.load %arg4[%c0_27, %c0_28] : memref<16x128xf32, #tpu.memory_space<vmem>>, vector<16x128xf32>
    %52 = vector.shape_cast %51 : vector<16x128xf32> to vector<1x16x128xf32>
    %53 = vector.broadcast %52 : vector<1x16x128xf32> to vector<2x16x128xf32>
    %54 = arith.mulf %50, %53 : vector<2x16x128xf32>
    %cst_29 = arith.constant dense<0xFF800000> : vector<2x128xf32>
    %55 = vector.multi_reduction <maximumf>, %54, %cst_29 [1] : vector<2x16x128xf32> to vector<2x128xf32>
    %56 = arith.truncf %55 : vector<2x128xf32> to vector<2x128xbf16>
    %c0_30 = arith.constant 0 : index
    %c0_31 = arith.constant 0 : index
    %57 = vector.load %arg5[%c0_30, %c0_31] : memref<128x128xbf16, #tpu.memory_space<vmem>>, vector<128x128xbf16>
    %cst_32 = arith.constant dense<0.000000e+00> : vector<2x128xf32>
    %58 = tpu.matmul %56, %57, %cst_32 {dimension_numbers = #tpu.dot_dimension_numbers<[1], [0], [0], [1], [0, 0, 1, 1], [], []>} : vector<2x128xbf16>, vector<128x128xbf16>, vector<2x128xf32> -> vector<2x128xf32>
    %c0_33 = arith.constant 0 : index
    %c0_34 = arith.constant 0 : index
    %59 = vector.load %arg6[%c0_33, %c0_34] : memref<1x128xf32, #tpu.memory_space<vmem>>, vector<1x128xf32>
    %60 = vector.broadcast %59 : vector<1x128xf32> to vector<2x128xf32>
    %61 = arith.addf %58, %60 : vector<2x128xf32>
    %c0_35 = arith.constant 0 : index
    %c0_36 = arith.constant 0 : index
    %62 = vector.load %arg7[%c0_35, %c0_36] : memref<2x128xf32, #tpu.memory_space<vmem>>, vector<2x128xf32>
    tpu.vector_store %arg7[%c0_35, %c0_36], %61 {strides = array<i32>} : memref<2x128xf32, #tpu.memory_space<vmem>>, vector<2x128xf32>,
    return
  }
  func.func @transform_0(%arg0: i32) -> (i32, i32, i32) {
    %c0_i32 = arith.constant 0 : i32
    %c0_i32_0 = arith.constant 0 : i32
    %c0_i32_1 = arith.constant 0 : i32
    return %arg0, %c0_i32, %c0_i32_0 : i32, i32, i32
  }
  func.func @transform_1(%arg0: i32) -> (i32, i32, i32) {
    %c0_i32 = arith.constant 0 : i32
    %c0_i32_0 = arith.constant 0 : i32
    %c0_i32_1 = arith.constant 0 : i32
    %c0_i32_2 = arith.constant 0 : i32
    return %c0_i32, %c0_i32_0, %c0_i32_1 : i32, i32, i32
  }
  func.func @transform_2(%arg0: i32) -> (i32, i32) {
    %c0_i32 = arith.constant 0 : i32
    %c0_i32_0 = arith.constant 0 : i32
    %c0_i32_1 = arith.constant 0 : i32
    return %c0_i32, %c0_i32_0 : i32, i32
  }
  func.func @transform_3(%arg0: i32) -> (i32, i32) {
    %c0_i32 = arith.constant 0 : i32
    %c0_i32_0 = arith.constant 0 : i32
    %c0_i32_1 = arith.constant 0 : i32
    return %c0_i32, %c0_i32_0 : i32, i32
  }
  func.func @transform_4(%arg0: i32) -> (i32, i32) {
    %c0_i32 = arith.constant 0 : i32
    %c0_i32_0 = arith.constant 0 : i32
    %c0_i32_1 = arith.constant 0 : i32
    return %c0_i32, %c0_i32_0 : i32, i32
  }
  func.func @transform_5(%arg0: i32) -> (i32, i32) {
    %c0_i32 = arith.constant 0 : i32
    %c0_i32_0 = arith.constant 0 : i32
    %c0_i32_1 = arith.constant 0 : i32
    return %c0_i32, %c0_i32_0 : i32, i32
  }
  func.func @transform_6(%arg0: i32) -> (i32, i32) {
    %c0_i32 = arith.constant 0 : i32
    %c0_i32_0 = arith.constant 0 : i32
    return %arg0, %c0_i32 : i32, i32
  }
}

</mosaic_0001>

<bundles_post_ra>
// kernel: cnn_text_forward.1
= control target key start
LH: loop header
LB: loop body
LE: loop exit
PB: predicated region body
PF: predicated region fallthrough
CT: control target
= control target key end

     0   :  { %11 = vsyncpa [#allocation3], 0  ;;  %s1703_s0 = inlined_call_operand.vmem [shape: bf16[2,22,128], index: 0, kind: input, shape index: {}]   ;;  %s1704_s1 = inlined_call_operand.hbm [shape: bf16[7,128,128], index: 1, kind: input, shape index: {}]   ;;  %s1705_s2 = inlined_call_operand.vmem [shape: f32[1,128], index: 2, kind: input, shape index: {}]   ;;  %s1706_s3 = inlined_call_operand.vmem [shape: f32[16,128], index: 3, kind: input, shape index: {}]   ;;  %s1707_s4 = inlined_call_operand.vmem [shape: bf16[128,128], index: 4, kind: input, shape index: {}]   ;;  %s1708_s5 = inlined_call_operand.vmem [shape: f32[1,128], index: 5, kind: input, shape index: {}]   ;;  %s1709_s6 = inlined_call_operand.hbm [shape: f32[2,128], index: 6, kind: output, shape index: {}]  }
   0x1   :  { %12 = vsyncpa [#allocation4], 0  ;;  %s19_s23 = sshll.u32 %s1704_s1, 4  ;;  %s1414_s24 = smov [#allocation2]   ;;  %s20_s23 = int_to_ptr.hbm [resolvable:$true] %s19_s23 }
   0x2   :  { %s21_s25 = sshll.u32 %s1414_s24, 4  ;;  %s1415_s26 = smov 64   ;;  %s22_s25 = int_to_ptr.vmem [resolvable:$true] %s21_s25 }
   0x3   :  { %s1416_s27 = smov 4  }
   0x4   :  { %27 = dma.hbm_to_vmem [thread:$0]  %s20_s23, 7168, %s22_s25, [#allocation3], %s1415_s26, %s1415_s26, %s1416_s27  }
   0x5   :  { %1410 = dma.done.wait [#allocation3], 7168  }
   0x6   :  { %1411 = vsyncadd [#allocation3], 4294960128  ;;  %v1307_v0 = vld [vmem:[#allocation2 + $0x78] sm:$0xff]  ;;  %v1306_v4 = vld [vmem:[#allocation2 + $0x70] sm:$0xff]  ;;  %vm62_vm0 = vsmask.f32 3328 }
   0x7   :  { %v1299_v1 = vld [vmem:[#allocation2 + $0x38] sm:$0xff]  ;;  %186 = vmatpush.bf16.msra.mxu0 %v1307_v0  ;;  %v1298_v5 = vld [vmem:[#allocation2 + $0x30] sm:$0xff]  ;;  %v1305_v8 = vld [vmem:[#allocation2 + $0x68] sm:$0xff]  ;;  %vm63_vm1 = vsmask.f32 7440  ;;  %vm286_vm2 = vcmask 1042432  }
   0x8   :  { %v1315_v2 = vld [vmem:[#allocation2 + $0xb8] sm:$0xff]  ;;  %265 = vmatpush.bf16.msra.mxu1 %v1299_v1  ;;  %v1314_v6 = vld [vmem:[#allocation2 + $0xb0] sm:$0xff]  ;;  %v1297_v9 = vld [vmem:[#allocation2 + $0x28] sm:$0xff]  ;;  %vm287_vm3 = vcmask 1046532   ;;  %vm399_vm4 = vsmask.f32 2304 }
   0x9   :  { %v1323_v3 = vld [vmem:[#allocation2 + $0xf8] sm:$0xff]  ;;  %376 = vmatpush.bf16.msra.mxu2 %v1315_v2  ;;  %v1322_v7 = vld [vmem:[#allocation2 + $0xf0] sm:$0xff]  ;;  %v1313_v10 = vld [vmem:[#allocation2 + $0xa8] sm:$0xff]  ;;  %vm400_vm5 = vsmask.f32 6416  ;;  %vm528_vm9 = vcmask 1041408  }
   0xa   :  { %505 = vmatpush.bf16.msra.mxu3 %v1323_v3  ;;  %v1321_v11 = vld [vmem:[#allocation2 + $0xe8] sm:$0xff]  ;;  %v1304_v12 = vld [vmem:[#allocation2 + $0x60] sm:$0xff]  ;;  %v1303_v26 = vld [vmem:[#allocation2 + $0x58] sm:$0xff]  ;;  %vm529_vm10 = vcmask 1045508   ;;  %vm641_vm11 = vsmask.f32 1280 }
   0xb   :  { %187 = vmatpush.bf16.msra.mxu0 %v1306_v4  ;;  %v1296_v13 = vld [vmem:[#allocation2 + $0x20] sm:$0xff]  ;;  %v1469_v18 = vld [vmem:[%s1703_s0 + $0x8] sm:$0x7]  ;;  %v1295_v27 = vld [vmem:[#allocation2 + $0x18] sm:$0xff]  ;;  %vm642_vm12 = vsmask.f32 5392 }
   0xc   :  { %266 = vmatpush.bf16.msra.mxu1 %v1298_v5  ;;  %v1312_v14 = vld [vmem:[#allocation2 + $0xa0] sm:$0xff]  ;;  %v1489_v30 = vshll.u32 %v1469_v18, 16  ;;  %v1311_v32 = vld [vmem:[#allocation2 + $0x98] sm:$0xff]  ;;  %v294_v38 = vrot.slane %v1469_v18, 5  ;;  %v1302_v41 = vld [vmem:[#allocation2 + $0x50] sm:$0xff]  ;;  %v411_v46 = vshrl.u32 %v1469_v18, 16 }
   0xd   :  { %377 = vmatpush.bf16.msra.mxu2 %v1314_v6  ;;  %v1320_v15 = vld [vmem:[#allocation2 + $0xe0] sm:$0xff]  ;;  %v1319_v33 = vld [vmem:[#allocation2 + $0xd8] sm:$0xff]  ;;  %vm1499_vm6 = vmor %vm286_vm2, %vm287_vm3  ;;  %vm766_vm13 = vcmask 1040384   ;;  %vm767_vm14 = vcmask 1044484   ;;  %vm937_vm2 = vcmask 1041409   ;;  %s1417_s14 = smov [#allocation5]  }
   0xe   :  { %506 = vmatpush.bf16.msra.mxu3 %v1322_v7  ;;  %v1459_v16 = vld [vmem:[%s1703_s0] sm:$0xf]  ;;  %v1464_v17 = vld [vmem:[%s1703_s0 + $0x4] sm:$0xf]  ;;  %v1294_v47 = vld [vmem:[#allocation2 + $0x10] sm:$0xff]  ;;  %v87_v50 = vrot.slane %v1489_v30, 5 }
   0xf   :  { %188 = vmatpush.bf16.msra.mxu0 %v1305_v8  ;;  %v1472_v19 = vshrl.u32 %v1459_v16, 16  ;;  %v1475_v20 = vshll.u32 %v1459_v16, 16  ;;  %v1478_v21 = vshll.u32 %v1464_v17, 16  ;;  %v1481_v22 = vshrl.u32 %v1464_v17, 16  ;;  %vm1506_vm7 = vmor %vm62_vm0, %vm63_vm1  ;;  %v1515_v53 = vld [vmem:[%s1703_s0 + $0xc] sm:$0xf] }
  0x10   :  { %267 = vmatpush.bf16.msra.mxu1 %v1297_v9  ;;  %v291_v25 = vrot.slane %v1464_v17, 5  ;;  %v1092_v35 = vrot.slane %v1459_v16, 9  ;;  %v414_v52 = vrot.slane %v1489_v30, 6  ;;  %v1310_v54 = vld [vmem:[#allocation2 + $0x90] sm:$0xff]  ;;  %v413_v56 = vrot.slane %v411_v46, 5  ;;  %vm1532_vm8 = vmor %vm399_vm4, %vm400_vm5  ;;  %v1301_v2 = vld [vmem:[#allocation2 + $0x48] sm:$0xff] }
  0x11   :  { %378 = vmatpush.bf16.msra.mxu2 %v1313_v10  ;;  %v68_v23 = vrot.slane %v1472_v19, 4  ;;  %v71_v24 = vrot.slane %v1475_v20, 5  ;;  %v77_v28 = vrot.slane %v1478_v21, 5  ;;  %v81_v29 = vrot.slane %v1481_v22, 4  ;;  %v1318_v55 = vld [vmem:[#allocation2 + $0xd0] sm:$0xff]  ;;  %v1293_v3 = vld [vmem:[#allocation2 + $0x8] sm:$0xff]  ;;  %vm1607_vm15 = vmor %vm528_vm9, %vm529_vm10 }
  0x12   :  { %507 = vmatpush.bf16.msra.mxu3 %v1321_v11  ;;  %v402_v31 = vrot.slane %v1472_v19, 5  ;;  %v403_v36 = vrot.slane %v1475_v20, 6  ;;  %v406_v39 = vrot.slane %v1481_v22, 5  ;;  %v407_v40 = vrot.slane %v1478_v21, 6  ;;  %v1522_v57 = vld [vmem:[%s1703_s0 + $0x10] sm:$0xf]  ;;  %vm1615_vm0 = vmor %vm641_vm11, %vm642_vm12 }
  0x13   :  { %189 = vmatpush.bf16.msra.mxu0 %v1304_v12  ;;  %v72_v34 = vor.u32 %v71_v24, %v68_v23  ;;  %v82_v37 = vor.u32 %v81_v29, %v77_v28  ;;  %v293_v44 = vrot.slane %v291_v25, 4  ;;  %v292_v58 = vsel %vm1499_vm6, %v1092_v35, %v291_v25  ;;  %v1309_v8 = vld [vmem:[#allocation2 + $0x88] sm:$0xff]  ;;  %v1557_v12 = vld [vmem:[%s1703_s0 + $0x14] sm:$0x7]  ;;  %v1300_v24 = vld [vmem:[#allocation2 + $0x40] sm:$0xff]  ;;  %s1008_s15 = sshll.u32 %s1417_s14, 4  ;;  %s1009_s15 = int_to_ptr.vmem [resolvable:$true] %s1008_s15 }
  0x14   :  { %268 = vmatpush.bf16.msra.mxu1 %v1296_v13  ;;  %v404_v45 = vor.u32 %v403_v36, %v402_v31  ;;  %v408_v51 = vor.u32 %v407_v40, %v406_v39  ;;  %v415_v0 = vor.u32 %v414_v52, %v413_v56  ;;  %v1537_v1 = vshrl.u32 %v1515_v53, 16  ;;  %v1317_v9 = vld [vmem:[#allocation2 + $0xc8] sm:$0xff]  ;;  %v1292_v25 = vld [vmem:[#allocation2] sm:$0xff]  ;;  %v1347_v36 = vld [vmem:[#allocation2 + $0x1b8] sm:$0xff]  ;;  %s1010_s18 = sshll.u32 %s1709_s6, 4  ;;  %s1011_s18 = int_to_ptr.hbm [resolvable:$true] %s1010_s18 }
  0x15   :  { %379 = vmatpush.bf16.msra.mxu2 %v1312_v14  ;;  %v73_v42 = vrot.slane %v72_v34, 4  ;;  %v83_v49 = vrot.slane %v82_v37, 4  ;;  %v295_v62 = vsel %vm1499_vm6, %v293_v44, %v294_v38  ;;  %v1542_v5 = vshll.u32 %v1515_v53, 16  ;;  %v1308_v31 = vld [vmem:[#allocation2 + $0x80] sm:$0xff]  ;;  %v1331_v37 = vld [vmem:[#allocation2 + $0x138] sm:$0xff]  ;;  %v1330_v56 = vld [vmem:[#allocation2 + $0x130] sm:$0xff] }
  0x16   :  { %508 = vmatpush.bf16.msra.mxu3 %v1320_v15  ;;  %v405_v59 = vrot.slane %v404_v45, 4  ;;  %v410_v60 = vrot.slane %v408_v51, 4  ;;  %v1545_v6 = vshll.u32 %v1522_v57, 16  ;;  %v1548_v7 = vshrl.u32 %v1522_v57, 16  ;;  %v1290_v44 = vld [vmem:[%s1703_s0] sm:$0xff]  ;;  %v1327_v63 = vld [vmem:[#allocation2 + $0x118] sm:$0xff]  ;;  %vm1622_vm1 = vmor %vm766_vm13, %vm767_vm14 }
  0x17   :  { %190 = vmatpush.bf16.msra.mxu0 %v1303_v26  ;;  %v78_v61 = vsel %vm1506_vm7, %v73_v42, %v77_v28  ;;  %v88_v4 = vsel %vm1506_vm7, %v83_v49, %v87_v50  ;;  %v320_v15 = vunpack.c.l.b16 %v292_v58  ;;  %v321_v23 = vunpack.c.l.b16 %v295_v62  ;;  %v1339_v50 = vld [vmem:[#allocation2 + $0x178] sm:$0xff] }
  0x18   :  { %269 = vmatpush.bf16.msra.mxu1 %v1295_v27  ;;  %v409_v10 = vsel %vm1532_vm8, %v405_v59, %v408_v51  ;;  %v416_v11 = vsel %vm1532_vm8, %v410_v60, %v415_v0  ;;  %v130_v13 = vunpack.c.l.b16 %v78_v61  ;;  %v131_v14 = vunpack.c.l.b16 %v88_v4 }
  0x19   :  { %380 = vmatpush.bf16.msra.mxu2 %v1311_v32  ;;  %v92_v26 = vrot.slane %v1537_v1, 4  ;;  %v95_v27 = vrot.slane %v1542_v5, 5  ;;  %v101_v28 = vrot.slane %v1545_v6, 5  ;;  %v105_v29 = vrot.slane %v1548_v7, 4  ;;  %v1316_v32 = vld [vmem:[#allocation2 + $0xc0] sm:$0xff] }
  0x1a   :  { %509 = vmatpush.bf16.msra.mxu3 %v1319_v33  ;;  %v449_v33 = vunpack.c.l.b16 %v409_v10  ;;  %v450_v34 = vunpack.c.l.b16 %v416_v11  ;;  %v1564_v35 = vshll.u32 %v1557_v12, 16  ;;  %v417_v38 = vrot.slane %v1537_v1, 5  ;;  %v1345_v10 = vld [vmem:[#allocation2 + $0x1a8] sm:$0xff] }
  0x1b   :  { %191 = vmatpush.bf16.msra.mxu0 %v1302_v41  ;;  %v418_v39 = vrot.slane %v1542_v5, 6  ;;  %v421_v40 = vrot.slane %v1548_v7, 5  ;;  %v422_v41 = vrot.slane %v1545_v6, 6  ;;  %v134_v42 = vpack.c.b16 %v131_v14, %v130_v13  ;;  %v1329_v11 = vld [vmem:[#allocation2 + $0x128] sm:$0xff] }
  0x1c   :  { %270 = vmatpush.bf16.msra.mxu1 %v1294_v47  ;;  %v298_v45 = vrot.slane %v1522_v57, 5  ;;  %v426_v47 = vshrl.u32 %v1557_v12, 16  ;;  %v324_v49 = vpack.c.b16 %v321_v23, %v320_v15  ;;  %v96_v51 = vor.u32 %v95_v27, %v92_v26 }
  0x1d   :  { %381 = vmatpush.bf16.msra.mxu2 %v1310_v54  ;;  %v106_v52 = vor.u32 %v105_v29, %v101_v28  ;;  %v453_v54 = vpack.c.b16 %v450_v34, %v449_v33  ;;  %v419_v58 = vor.u32 %v418_v39, %v417_v38  ;;  %v423_v59 = vor.u32 %v422_v41, %v421_v40  ;;  %v1344_v29 = vld [vmem:[#allocation2 + $0x1a0] sm:$0xff] }
  0x1e   :  { %510 = vmatpush.bf16.msra.mxu3 %v1318_v55  ;;  %v1346_v55 = vld [vmem:[#allocation2 + $0x1b0] sm:$0xff]  ;;  %v428_v60 = vrot.slane %v426_v47, 5  ;;  %v429_v61 = vrot.slane %v1564_v35, 6  ;;  %v1093_v62 = vrot.slane %v1515_v53, 9  ;;  %v300_v0 = vrot.slane %v298_v45, 4  ;;  %v1336_v38 = vld [vmem:[#allocation2 + $0x160] sm:$0xff] }
  0x1f   :  { %192 = vmatpush.bf16.msra.mxu0 %v1301_v2  ;;  %v301_v2 = vrot.slane %v1557_v12, 5  ;;  %v97_v4 = vrot.slane %v96_v51, 4  ;;  %v420_v13 = vrot.slane %v419_v58, 4  ;;  %v425_v14 = vrot.slane %v423_v59, 4  ;;  %v1326_v58 = vld [vmem:[#allocation2 + $0x110] sm:$0xff] }
  0x20   :  { %271 = vmatpush.bf16.msra.mxu1 %v1293_v3  ;;  %v1338_v3 = vld [vmem:[#allocation2 + $0x170] sm:$0xff]  ;;  %v430_v15 = vor.u32 %v429_v61, %v428_v60  ;;  %v299_v23 = vsel %vm1499_vm6, %v1093_v62, %v298_v45  ;;  %v645_v48 = vrot.slane %v1475_v20, 7  ;;  %v648_v39 = vrot.slane %v1481_v22, 6  ;;  %v1343_v45 = vld [vmem:[#allocation2 + $0x198] sm:$0xff] }
  0x21   :  { %382 = vmatpush.bf16.msra.mxu2 %v1309_v8  ;;  %v107_v8 = vrot.slane %v106_v52, 4  ;;  %v102_v26 = vsel %vm1506_vm7, %v97_v4, %v101_v28  ;;  %v424_v34 = vsel %vm1532_vm8, %v420_v13, %v423_v59  ;;  %v644_v28 = vrot.slane %v1472_v19, 6  ;;  %v1335_v20 = vld [vmem:[#allocation2 + $0x158] sm:$0xff] }
  0x22   :  { %511 = vmatpush.bf16.msra.mxu3 %v1317_v9  ;;  %v111_v9 = vrot.slane %v1564_v35, 5  ;;  %v431_v43 = vsel %vm1532_vm8, %v425_v14, %v430_v15  ;;  %v649_v40 = vrot.slane %v1478_v21, 7  ;;  %v451_v41 = vunpack.c.l.b16 %v424_v34  ;;  %v1333_v14 = vld [vmem:[#allocation2 + $0x148] sm:$0xff] }
  0x23   :  { %193 = vmatpush.bf16.msra.mxu0 %v1300_v24  ;;  %v302_v24 = vsel %vm1499_vm6, %v300_v0, %v301_v2  ;;  %v533_v19 = vrot.slane %v1464_v17, 6  ;;  %v646_v22 = vor.u32 %v645_v48, %v644_v28  ;;  %v653_v51 = vrot.slane %v411_v46, 6 }
  0x24   :  { %272 = vmatpush.bf16.msra.mxu1 %v1292_v25  ;;  %v1337_v25 = vld [vmem:[#allocation2 + $0x168] sm:$0xff]  ;;  %v112_v27 = vsel %vm1506_vm7, %v107_v8, %v111_v9  ;;  %v323_v33 = vunpack.c.l.b16 %v302_v24  ;;  %v650_v21 = vor.u32 %v649_v40, %v648_v39  ;;  %v654_v52 = vrot.slane %v1489_v30, 7 }
  0x25   :  { %383 = vmatpush.bf16.msra.mxu2 %v1308_v31  ;;  %v1328_v31 = vld [vmem:[#allocation2 + $0x120] sm:$0xff]  ;;  %v1158_v30 = vrot.slane %v1459_v16, 10  ;;  %v535_v46 = vrot.slane %v533_v19, 4  ;;  %v536_v60 = vrot.slane %v1469_v18, 6  ;;  %v647_v62 = vrot.slane %v646_v22, 4 }
  0x26   :  { %512 = vmatpush.bf16.msra.mxu3 %v1316_v32  ;;  %194 = vmatmul.bf16.vlgmr.msra.gmra.mxu0 %v134_v42  ;;  %v322_v32 = vunpack.c.l.b16 %v299_v23  ;;  %v452_v42 = vunpack.c.l.b16 %v431_v43  ;;  %v652_v0 = vrot.slane %v650_v21, 4  ;;  %v655_v2 = vor.u32 %v654_v52, %v653_v51  ;;  %v1332_v43 = vld [vmem:[#allocation2 + $0x140] sm:$0xff] }
  0x27   :  { %618 = vmatpush.bf16.msrb.mxu0 %v1331_v37  ;;  %273 = vmatmul.bf16.vlgmr.msra.gmra.mxu1 %v1290_v44  ;;  %v133_v37 = vunpack.c.l.b16 %v112_v27  ;;  %v774_v9 = vrot.slane %v1469_v18, 7  ;;  %v534_v13 = vsel %vm1607_vm15, %v1158_v30, %v533_v19  ;;  %v651_v15 = vsel %vm1615_vm0, %v647_v62, %v650_v21 }
  0x28   :  { %384 = vmatmul.bf16.vlgmr.msra.gmra.mxu2 %v324_v49  ;;  %743 = vmatpush.bf16.msrb.mxu1 %v1339_v50  ;;  %v325_v44 = vpack.c.b16 %v323_v33, %v322_v32  ;;  %v1291_v50 = vld [vmem:[%s1703_s0 + $0xc] sm:$0xff]  ;;  %v656_v23 = vsel %vm1615_vm0, %v652_v0, %v655_v2  ;;  %v562_v27 = vunpack.c.l.b16 %v534_v13  ;;  %v657_v34 = vrot.slane %v1537_v1, 6 }
  0x29   :  { %856 = vmatpush.bf16.msrb.mxu2 %v1347_v36  ;;  %513 = vmatmul.bf16.vlgmr.msra.gmra.mxu3 %v453_v54  ;;  %v132_v36 = vunpack.c.l.b16 %v102_v26  ;;  %v454_v54 = vpack.c.b16 %v452_v42, %v451_v41  ;;  %v1324_v26 = vld [vmem:[#allocation2 + $0x100] sm:$0xff]  ;;  %v688_v32 = vunpack.c.l.b16 %v656_v23  ;;  %v662_v28 = vrot.slane %v1545_v6, 7 }
  0x2a   :  { %v540_v40 = vrot.slane %v1522_v57, 6  ;;  %v666_v41 = vrot.slane %v426_v47, 6  ;;  %v1159_v6 = vrot.slane %v1515_v53, 10  ;;  %v1225_v47 = vrot.slane %v1515_v53, 11 }
  0x2b   :  { %619 = vmatpush.bf16.msrb.mxu0 %v1330_v56  ;;  %v135_v49 = vpack.c.b16 %v133_v37, %v132_v36  ;;  %v1342_v56 = vld [vmem:[#allocation2 + $0x190] sm:$0xff]  ;;  %v658_v37 = vrot.slane %v1542_v5, 7  ;;  %v778_v5 = vrot.slane %v1522_v57, 7  ;;  %v781_v22 = vrot.slane %v1557_v12, 7 }
  0x2c   :  { %744 = vmatpush.bf16.msrb.mxu1 %v1338_v3  ;;  %v1224_v3 = vrot.slane %v1459_v16, 11  ;;  %v537_v16 = vsel %vm1607_vm15, %v535_v46, %v536_v60 }
  0x2d   :  { %857 = vmatpush.bf16.msrb.mxu2 %v1346_v55  ;;  %v771_v55 = vrot.slane %v1464_v17, 7  ;;  %v1334_v17 = vld [vmem:[#allocation2 + $0x150] sm:$0xff]  ;;  %v659_v42 = vor.u32 %v658_v37, %v657_v34  ;;  %v779_v52 = vsel %vm1622_vm1, %v1225_v47, %v778_v5 }
  0x2f   :  { %620 = vmatpush.bf16.msrb.mxu0 %v1329_v11  ;;  %v773_v8 = vrot.slane %v771_v55, 4  ;;  %v1325_v11 = vld [vmem:[#allocation2 + $0x108] sm:$0xff]  ;;  %v772_v18 = vsel %vm1622_vm1, %v1224_v3, %v771_v55 }
  0x30   :  { %745 = vmatpush.bf16.msrb.mxu1 %v1337_v25  ;;  %v1340_v25 = vld [vmem:[#allocation2 + $0x180] sm:$0xff]  ;;  %v800_v33 = vunpack.c.l.b16 %v772_v18 }
  0x31   :  { %858 = vmatpush.bf16.msrb.mxu2 %v1345_v10  ;;  %v1341_v10 = vld [vmem:[#allocation2 + $0x188] sm:$0xff]  ;;  %v775_v24 = vsel %vm1622_vm1, %v773_v8, %v774_v9 }
  0x32   :  { %v801_v36 = vunpack.c.l.b16 %v775_v24 }
  0x33   :  { %621 = vmatpush.bf16.msrb.mxu0 %v1328_v31  ;;  %v687_v31 = vunpack.c.l.b16 %v651_v15 }
  0x34   :  { %746 = vmatpush.bf16.msrb.mxu1 %v1336_v38  ;;  %v661_v38 = vrot.slane %v1548_v7, 6  ;;  %v804_v1 = vpack.c.b16 %v801_v36, %v800_v33  ;;  %v542_v7 = vrot.slane %v540_v40, 4  ;;  %v1353_v33 = vld [vmem:[%s1707_s4 + $0x28] sm:$0xff] }
  0x35   :  { %859 = vmatpush.bf16.msrb.mxu2 %v1344_v29  ;;  %v563_v29 = vunpack.c.l.b16 %v537_v16  ;;  %v691_v39 = vpack.c.b16 %v688_v32, %v687_v31 }
  0x36   :  { %199 = vmatmul.bf16.gmra.mxu0 %v135_v49  ;;  %v660_v49 = vrot.slane %v659_v42, 4  ;;  %v1351_v42 = vld [vmem:[%s1707_s4 + $0x18] sm:$0xff] }
  0x37   :  { %622 = vmatpush.bf16.msrb.mxu0 %v1327_v63  ;;  %278 = vmatmul.bf16.gmra.mxu1 %v1291_v50  ;;  %v566_v48 = vpack.c.b16 %v563_v29, %v562_v27  ;;  %v543_v63 = vrot.slane %v1557_v12, 6 }
  0x38   :  { %389 = vmatmul.bf16.gmra.mxu2 %v325_v44  ;;  %747 = vmatpush.bf16.msrb.mxu1 %v1335_v20  ;;  %v663_v44 = vor.u32 %v662_v28, %v661_v38  ;;  %v780_v20 = vrot.slane %v778_v5, 4  ;;  %v1352_v38 = vld [vmem:[%s1707_s4 + $0x20] sm:$0xff] }
  0x39   :  { %860 = vmatpush.bf16.msrb.mxu2 %v1343_v45  ;;  %518 = vmatmul.bf16.gmra.mxu3 %v454_v54  ;;  %v667_v45 = vrot.slane %v1564_v35, 7  ;;  %v541_v35 = vsel %vm1607_vm15, %v1159_v6, %v540_v40  ;;  %v544_v57 = vsel %vm1607_vm15, %v542_v7, %v543_v63 }
  0x3a   :  { %v665_v50 = vrot.slane %v663_v44, 4  ;;  %v664_v21 = vsel %vm1615_vm0, %v660_v49, %v663_v44  ;;  %v782_v53 = vsel %vm1622_vm1, %v780_v20, %v781_v22  ;;  %v564_v54 = vunpack.c.l.b16 %v541_v35  ;;  %v1350_v49 = vld [vmem:[%s1707_s4 + $0x10] sm:$0xff]  ;;  %v1349_v22 = vld [vmem:[%s1707_s4 + $0x8] sm:$0xff]  ;;  %v891_v35 = vld [vmem:[%s1706_s3] sm:$0xff] }
  0x3b   :  { %623 = vmatpush.bf16.msrb.mxu0 %v1326_v58  ;;  %v668_v19 = vor.u32 %v667_v45, %v666_v41  ;;  %v565_v12 = vunpack.c.l.b16 %v544_v57  ;;  %v689_v55 = vunpack.c.l.b16 %v664_v21  ;;  %v802_v58 = vunpack.c.l.b16 %v779_v52  ;;  %v892_v57 = vld [vmem:[%s1706_s3 + $0x8] sm:$0xff] }
  0x3c   :  { %748 = vmatpush.bf16.msrb.mxu1 %v1334_v17  ;;  %v803_v30 = vunpack.c.l.b16 %v782_v53 }
  0x3d   :  { %861 = vmatpush.bf16.msrb.mxu2 %v1342_v56  ;;  %v669_v51 = vsel %vm1615_vm0, %v665_v50, %v668_v19  ;;  %v567_v59 = vpack.c.b16 %v565_v12, %v564_v54 }
  0x3e   :  { %v690_v56 = vunpack.c.l.b16 %v669_v51  ;;  %v805_v60 = vpack.c.b16 %v803_v30, %v802_v58 }
  0x3f   :  { %624 = vmatpush.bf16.msrb.mxu0 %v1325_v11 }
  0x40   :  { %749 = vmatpush.bf16.msrb.mxu1 %v1333_v14  ;;  %v692_v46 = vpack.c.b16 %v690_v56, %v689_v55  ;;  %v1355_v14 = vld [vmem:[%s1707_s4 + $0x38] sm:$0xff]  ;;  %v1348_v56 = vld [vmem:[%s1707_s4] sm:$0xff] }
  0x41   :  { %862 = vmatpush.bf16.msrb.mxu2 %v1341_v10  ;;  %989 = vmatpush.bf16.msrb.mxu3 %v1355_v14 }
  0x43   :  { %625 = vmatpush.bf16.msrb.mxu0 %v1324_v26 }
  0x44   :  { %750 = vmatpush.bf16.msrb.mxu1 %v1332_v43 }
  0x45   :  { %863 = vmatpush.bf16.msrb.mxu2 %v1340_v25  ;;  %v1354_v25 = vld [vmem:[%s1707_s4 + $0x30] sm:$0xff] }
  0x46   :  { %626 = vmatmul.bf16.vlgmr.msrb.gmra.mxu0 %v566_v48  ;;  %990 = vmatpush.bf16.msrb.mxu3 %v1354_v25 }
  0x47   :  { %751 = vmatmul.bf16.vlgmr.msrb.gmra.mxu1 %v691_v39  ;;  %v1360_v39 = vld [vmem:[%s1705_s2] ss:$0 sm:$0xff] }
  0x48   :  { %864 = vmatmul.bf16.vlgmr.msrb.gmra.mxu2 %v804_v1 }
  0x4a   :  { %991 = vmatpush.bf16.msrb.mxu3 %v1353_v33 }
  0x4e   :  { %992 = vmatpush.bf16.msrb.mxu3 %v1352_v38 }
  0x52   :  { %993 = vmatpush.bf16.msrb.mxu3 %v1351_v42 }
  0x56   :  { %631 = vmatmul.bf16.gmra.mxu0 %v567_v59  ;;  %994 = vmatpush.bf16.msrb.mxu3 %v1350_v49 }
  0x57   :  { %756 = vmatmul.bf16.gmra.mxu1 %v692_v46 }
  0x58   :  { %869 = vmatmul.bf16.gmra.mxu2 %v805_v60 }
  0x5a   :  { %995 = vmatpush.bf16.msrb.mxu3 %v1349_v22 }
  0x5e   :  { %996 = vmatpush.bf16.msrb.mxu3 %v1348_v56 }
  0xa3   :  { %v195_v17 = vpop.f32.mrf.mxu0 }
  0xa4   :  { %v274_v61 = vpop.f32.mrf.mxu1 }
  0xa5   :  { %v275_v16 = vadd.f32 %v274_v61, %v195_v17 }
  0xab   :  { %v385_v62 = vpop.f32.mrf.mxu2  ;;  %v197_v0 = vpop.f32.mrf.mxu0 }
  0xac   :  { %v276_v2 = vpop.f32.mrf.mxu1  ;;  %v514_v9 = vpop.f32.mrf.mxu3  ;;  %v395_v15 = vadd.f32 %v385_v62, %v275_v16 }
  0xad   :  { %v277_v27 = vadd.f32 %v276_v2, %v197_v0 }
  0xae   :  { %v524_v29 = vadd.f32 %v514_v9, %v395_v15 }
  0xb3   :  { %v387_v3 = vpop.f32.mrf.mxu2  ;;  %v200_v4 = vpop.f32.mrf.mxu0 }
  0xb4   :  { %v279_v8 = vpop.f32.mrf.mxu1  ;;  %v516_v26 = vpop.f32.mrf.mxu3  ;;  %v396_v31 = vadd.f32 %v387_v3, %v277_v27 }
  0xb5   :  { %v280_v1 = vadd.f32 %v279_v8, %v200_v4 }
  0xb6   :  { %v525_v43 = vadd.f32 %v516_v26, %v396_v31 }
  0xbb   :  { %v390_v10 = vpop.f32.mrf.mxu2  ;;  %v202_v11 = vpop.f32.mrf.mxu0 }
  0xbc   :  { %v281_v13 = vpop.f32.mrf.mxu1  ;;  %v519_v41 = vpop.f32.mrf.mxu3  ;;  %v397_v44 = vadd.f32 %v390_v10, %v280_v1 }
  0xbd   :  { %v282_v50 = vadd.f32 %v281_v13, %v202_v11 }
  0xbe   :  { %v526_v19 = vadd.f32 %v519_v41, %v397_v44 }
  0xc3   :  { %v392_v23 = vpop.f32.mrf.mxu2  ;;  %v627_v18 = vpop.f32.mrf.mxu0 }
  0xc4   :  { %v752_v24 = vpop.f32.mrf.mxu1  ;;  %v637_v32 = vadd.f32 %v627_v18, %v524_v29  ;;  %v398_v51 = vadd.f32 %v392_v23, %v282_v50  ;;  %v521_v54 = vpop.f32.mrf.mxu3 }
  0xc6   :  { %v762_v36 = vadd.f32 %v752_v24, %v637_v32  ;;  %v527_v30 = vadd.f32 %v521_v54, %v398_v51 }
  0xcb   :  { %v865_v34 = vpop.f32.mrf.mxu2  ;;  %v629_v37 = vpop.f32.mrf.mxu0 }
  0xcc   :  { %v754_v28 = vpop.f32.mrf.mxu1  ;;  %v875_v48 = vadd.f32 %v865_v34, %v762_v36  ;;  %v638_v40 = vadd.f32 %v629_v37, %v525_v43 }
  0xce   :  { %v883_v45 = vadd.f32 %v1360_v39, %v875_v48  ;;  %v763_v5 = vadd.f32 %v754_v28, %v638_v40  ;;  %v1361_v48 = vld [vmem:[%s1708_s5] ss:$0 sm:$0xff] }
  0xd0   :  { %v887_v47 = vmax.f32 %v883_v45, 0.0 }
  0xd2   :  { %v893_v12 = vmul.f32 %v891_v35, %v887_v47 }
  0xd3   :  { %v867_v6 = vpop.f32.mrf.mxu2  ;;  %v632_v63 = vpop.f32.mrf.mxu0 }
  0xd4   :  { %v876_v7 = vadd.f32 %v867_v6, %v763_v5  ;;  %v757_v21 = vpop.f32.mrf.mxu1  ;;  %v639_v53 = vadd.f32 %v632_v63, %v526_v19 }
  0xd6   :  { %v884_v20 = vadd.f32 %v1360_v39, %v876_v7  ;;  %v764_v46 = vadd.f32 %v757_v21, %v639_v53 }
  0xd8   :  { %v888_v52 = vmax.f32 %v884_v20, 0.0 }
  0xda   :  { %v894_v55 = vmul.f32 %v892_v57, %v888_v52 }
  0xdb   :  { %v870_v58 = vpop.f32.mrf.mxu2  ;;  %v634_v60 = vpop.f32.mrf.mxu0 }
  0xdc   :  { %v897_v59 = vmax.f32 %v893_v12, %v894_v55  ;;  %v877_v17 = vadd.f32 %v870_v58, %v764_v46  ;;  %v640_v61 = vadd.f32 %v634_v60, %v527_v30  ;;  %v759_v0 = vpop.f32.mrf.mxu1 }
  0xde   :  { %v898_v62 = vrot.slane %v897_v59, 4  ;;  %v885_v2 = vadd.f32 %v1360_v39, %v877_v17  ;;  %v765_v3 = vadd.f32 %v759_v0, %v640_v61 }
  0xe0   :  { %v899_v8 = vmax.f32 %v897_v59, %v898_v62  ;;  %v889_v10 = vmax.f32 %v885_v2, 0.0 }
  0xe2   :  { %v900_v13 = vrot.slane %v899_v8, 2  ;;  %v895_v14 = vmul.f32 %v891_v35, %v889_v10 }
  0xe3   :  { %v872_v4 = vpop.f32.mrf.mxu2 }
  0xe4   :  { %v878_v9 = vadd.f32 %v872_v4, %v765_v3  ;;  %v901_v23 = vmax.f32 %v899_v8, %v900_v13 }
  0xe6   :  { %v886_v11 = vadd.f32 %v1360_v39, %v878_v9  ;;  %v902_v26 = vrot.slane %v901_v23, 1 }
  0xe8   :  { %v890_v16 = vmax.f32 %v886_v11, 0.0  ;;  %v903_v31 = vmax.f32 %v901_v23, %v902_v26 }
  0xea   :  { %v896_v15 = vmul.f32 %v892_v57, %v890_v16  ;;  %v911_v34 = vpack.c.bf16 %v903_v31, %v903_v31 }
  0xec   :  { %v904_v18 = vmax.f32 %v895_v14, %v896_v15  ;;  %v935_v36 = vunpack.c.l.b16 %v911_v34 }
  0xee   :  { %v905_v24 = vrot.slane %v904_v18, 4 }
  0xf0   :  { %v906_v25 = vmax.f32 %v904_v18, %v905_v24 }
  0xf2   :  { %v907_v27 = vrot.slane %v906_v25, 2 }
  0xf4   :  { %v908_v29 = vmax.f32 %v906_v25, %v907_v27 }
  0xf6   :  { %v909_v32 = vrot.slane %v908_v29, 1 }
  0xf8   :  { %v910_v33 = vmax.f32 %v908_v29, %v909_v32 }
  0xfa   :  { %v912_v43 = vpack.c.bf16 %v910_v33, %v910_v33 }
  0xfc   :  { %v936_v37 = vunpack.c.l.b16 %v912_v43 }
  0xfe   :  { %v938_v38 = vsel %vm937_vm2, %v936_v37, %v935_v36 }
  0xff   :  { %v939_v28 = vpack.c.b16 %v938_v38, %v938_v38 }
 0x101   :  { %997 = vmatmul.bf16.vlgmr.msrb.gmra.mxu3 %v939_v28 }
 0x184   :  { %v998_v39 = vpop.f32.mrf.mxu3 }
 0x185   :  { %v999_v40 = vadd.f32 %v1361_v48, %v998_v39 }
 0x187   :  { %1002 = vst [vmem:[#allocation5] sm:$0x3] %v999_v40 }
 0x188   :  { %1013 = dma.vmem_to_hbm [thread:$0]  %s1009_s15, 32, %s1011_s18, [#allocation4]  }
 0x18c   :  { %v1000_v41 = vpop.f32.mrf.mxu3 }
 0x18d   :  { %1412 = dma.done.wait [#allocation4], 32  }
 0x18e   :  { %1413 = vsyncadd [#allocation4], 4294967264 }
 0x18f   :  { %1018 = vsyncpa [#allocation3], 1 }
 0x190   :  { %1019 = vsyncpa [#allocation4], 1 }

</bundles_post_ra>
